<compile_context>
chip_gen: v7x
topology: tpu7x:2x2x1
jax: 0.10.0
libtpu: 0.0.40
codegen_flags: <defaults>
</compile_context>

<pallas_src>
import functools
import math

import numpy as np
import jax
import jax.numpy as jnp
from jax.experimental import pallas as pl
from jax.experimental.pallas import tpu as pltpu


# ----------------------------------------------------------------------------
# small (but structurally faithful, lane-dense) config
# ----------------------------------------------------------------------------
config = {
    'embedding_dim': 128,
    'transformer_dim': 128,
    'transformer_hidden_dim': 128,
    'head_dim': 32,
    'num_head': 4,
    'num_layers': 2,
    'k': 2,
    'vocab_size': 100,
    'max_seq_len': 64,
    'dropout_prob': 0.1,
    'attention_dropout': 0.1,
    'seq_mode': 'bottom-up',
    'causal': False,
    'probe_layer': 'true',
}

_EPS = 1e-5   # nn.LayerNorm default


# ----------------------------------------------------------------------------
# row-blocked fused kernels (LN + matmul, out-proj + MLP, final LN)
# ----------------------------------------------------------------------------
def _ln_matmul_kernel(x_ref, g_ref, b_ref, w_ref, wb_ref, o_ref, *, eps):
    # LayerNorm over lanes, then one fused (rows, Din) @ (Din, 3*H*dh) matmul.
    x = x_ref[...]
    mu = jnp.mean(x, axis=-1, keepdims=True)
    xc = x - mu
    var = jnp.mean(xc * xc, axis=-1, keepdims=True)
    xn = xc * jax.lax.rsqrt(var + eps) * g_ref[...] + b_ref[...]
    o_ref[...] = (
        jnp.dot(xn, w_ref[...], preferred_element_type=jnp.float32) + wb_ref[...]
    )


def _out_mlp_kernel(attn_ref, x_ref, wff_ref, bff_ref, g_ref, bln_ref,
                    w1_ref, b1_ref, w2_ref, b2_ref, o_ref, *, eps):
    # attention output projection + residual (dropout = inference no-op)
    x1 = (jnp.dot(attn_ref[...], wff_ref[...], preferred_element_type=jnp.float32)
          + bff_ref[...] + x_ref[...])
    # LayerNorm2
    mu = jnp.mean(x1, axis=-1, keepdims=True)
    xc = x1 - mu
    var = jnp.mean(xc * xc, axis=-1, keepdims=True)
    xn = xc * jax.lax.rsqrt(var + eps) * g_ref[...] + bln_ref[...]
    # MLP
    h = jnp.dot(xn, w1_ref[...], preferred_element_type=jnp.float32) + b1_ref[...]
    # TODO(synk): PyTorch nn.GELU default is exact (erf); erf lowering inside
    # Mosaic is not guaranteed, so the tanh approximation is used in-kernel.
    h = 0.5 * h * (1.0 + jnp.tanh(0.7978845608028654 * (h + 0.044715 * h * h * h)))
    o_ref[...] = x1 + jnp.dot(h, w2_ref[...], preferred_element_type=jnp.float32) + b2_ref[...]


def _final_ln_kernel(x_ref, g_ref, b_ref, o_ref, *, eps):
    x = x_ref[...]
    mu = jnp.mean(x, axis=-1, keepdims=True)
    xc = x - mu
    var = jnp.mean(xc * xc, axis=-1, keepdims=True)
    o_ref[...] = xc * jax.lax.rsqrt(var + eps) * g_ref[...] + b_ref[...]


def _row_blocked_call(kernel_fn, row_inputs, const_inputs, out_dim):
    """Run a fused row-wise kernel over (Mp, F) slabs.

    Uses a 2-step 'parallel' row grid (both v7x TensorCores); each block is a
    multiple of 8 sublanes, lane dims always equal the full feature width.
    """
    Mp = int(row_inputs[0].shape[0])
    nblk = 2 if (Mp % 16 == 0 and Mp >= 16) else 1
    rb = Mp // nblk
    row_specs = [pl.BlockSpec((rb, int(a.shape[1])), lambda i: (i, 0))
                 for a in row_inputs]
    const_specs = [pl.BlockSpec(tuple(int(s) for s in a.shape), lambda i: (0, 0))
                   for a in const_inputs]
    return pl.pallas_call(
        kernel_fn,
        out_shape=jax.ShapeDtypeStruct((Mp, out_dim), jnp.float32),
        grid=(nblk,),
        in_specs=row_specs + const_specs,
        out_specs=pl.BlockSpec((rb, out_dim), lambda i: (i, 0)),
        compiler_params=pltpu.CompilerParams(dimension_semantics=("parallel",)),
    )(*row_inputs, *const_inputs)


# ----------------------------------------------------------------------------
# Sequoia tree structure helpers (pure python/numpy, static)
# ----------------------------------------------------------------------------
def build_levels(n, k):
    L_model = math.ceil(math.log(n) / math.log(k))
    L_rel = [0] + [math.ceil(n / k ** i) for i in range(L_model + 1)]
    L_ind = np.cumsum(np.array(L_rel))
    return L_model, L_rel, L_ind


def get_selectors(l, k, L_attn, L_rel, L_ind):
    """Exact port of SequoiaAttention.get_selectors with mask=True."""
    Nq = L_rel[l + 1]
    queries = range(Nq)

    def get_ancestor(j, i):
        if (j + 1) / L_rel[l + 2] <= i / L_rel[l + 1]:
            return int(L_ind[l + 1] + j)
        return 0

    def get_sibling(s, i):
        rel = min(i // k * k + s, L_rel[l + 1] - 1)
        return int(L_ind[l] + rel) if rel / L_rel[l + 1] <= i / L_rel[l + 1] else 0

    def get_child(c, i):
        rel = min(i * k + c, L_rel[l] - 1)
        return int(L_ind[l - 1] + rel) if rel / L_rel[l] <= i / L_rel[l + 1] else 0

    ancestors = None
    children = None
    if l < L_attn - 1:
        ancestors = np.asarray(
            [[get_ancestor(j, i) for j in range(L_rel[l + 2])] for i in queries],
            dtype=np.int32)
    siblings = np.asarray(
        [[get_sibling(s, i) for s in range(k)] for i in queries], dtype=np.int32)
    if l >= 1:
        children = np.asarray(
            [[get_child(c, i) for c in range(k)] for i in queries], dtype=np.int32)
    return ancestors, siblings, children


def build_attention_bias(n, k):
    """Convert the per-query selector tables into dense log-count bias matrices.

    For each (level, group) a matrix B (Nq, n_tot) holds log(count) where
    count = number of selector slots of query i pointing at tree node j, and
    -1e30 where count == 0.  The gathered softmax of the reference is then
    exactly softmax(scores + B) along the node axis.
    Groups of a level are stored contiguously so the kernel can take one
    static slice per level and run a single stacked 3-D softmax.
    """
    L_attn = math.ceil(math.log(n) / math.log(k)) + 1
    L_rel = [0] + [math.ceil(n / k ** i) for i in range(L_attn)]
    L_ind = np.cumsum(np.array(L_rel))
    n_tot = int(L_ind[-1])
    mats, level_slices = [], []
    for l in range(L_attn):
        anc, sib, chi = get_selectors(l, k, L_attn, L_rel, L_ind)
        g_start = len(mats)
        for sel in (anc, sib, chi):
            if sel is None:
                continue
            C = np.zeros((sel.shape[0], n_tot), np.float64)
            for i in range(sel.shape[0]):
                for s in range(sel.shape[1]):
                    C[i, int(sel[i, s])] += 1.0
            mats.append(np.where(C > 0.0, np.log(np.maximum(C, 1e-30)), -1e30)
                        .astype(np.float32))
        level_slices.append((g_start, len(mats) - g_start))
    Nq_max = L_rel[1]
    b_stack = np.full((len(mats), Nq_max, n_tot), -1e30, np.float32)
    for gi, B in enumerate(mats):
        b_stack[gi, :B.shape[0], :] = B
    return (L_attn, L_rel, [int(x) for x in L_ind], n_tot,
            jnp.asarray(b_stack), level_slices)


# ----------------------------------------------------------------------------
# Sequoia attention: whole bottom-up level loop in ONE kernel per layer
# ----------------------------------------------------------------------------
def _make_sequoia_kernel(b, n_tot, H, dh, L_ind, L_rel, level_slices, scale):
    HD = H * dh
    NT = (((1,), (1,)), ((), ()))   # contract last dims (scores = q @ k^T)
    NN = (((1,), (0,)), ((), ()))   # standard matmul (out = w @ v)

    def kernel(qkv_ref, bias_ref, o_ref):
        # qkv_ref : (Mp, 3*HD)  lanes = [ Q | K | V ], heads contiguous per dh
        # bias_ref: (G_tot, Nq_max, n_tot) static log-count bias matrices
        # o_ref   : (Mp, HD)    working / final V (combine_heads layout)
        o_ref[...] = qkv_ref[:, 2 * HD:3 * HD]            # init working V
        for l, (g0, ng) in enumerate(level_slices):       # bottom-up, sequential
            Nq = L_rel[l + 1]
            q0, q1 = L_ind[l], L_ind[l + 1]
            bias_l = bias_ref[g0:g0 + ng, :Nq, :]          # (ng, Nq, n_tot), shared
            for bi in range(b):
                base = bi * n_tot
                outs = []
                for h in range(H):
                    q = qkv_ref[base + q0:base + q1, h * dh:(h + 1) * dh]
                    kk = qkv_ref[base:base + n_tot, HD + h * dh:HD + (h + 1) * dh]
                    sd = jax.lax.dot_general(
                        q, kk, NT, preferred_element_type=jnp.float32) * scale
                    # stacked per-group masked softmax (exact gathered softmax)
                    z = sd[None, :, :] + bias_l            # (ng, Nq, n_tot)
                    m = jnp.max(z, axis=-1, keepdims=True)
                    e = jnp.exp(z - m)
                    w = jnp.sum(e / jnp.sum(e, axis=-1, keepdims=True), axis=0)
                    v_cur = o_ref[base:base + n_tot, h * dh:(h + 1) * dh]
                    outs.append(jax.lax.dot_general(
                        w, v_cur, NN, preferred_element_type=jnp.float32))
                # one lane-dense (Nq, HD) store per (level, batch)
                o_ref[base + q0:base + q1, :] = (
                    jnp.concatenate(outs, axis=-1) * (1.0 / 3.0))
    return kernel


# ----------------------------------------------------------------------------
# full model forward
# ----------------------------------------------------------------------------
def model_forward(params, input_ids, cfg):
    b, n = input_ids.shape
    d = cfg['transformer_dim']
    hid = cfg['transformer_hidden_dim']
    k = cfg['k']
    H, dh = cfg['num_head'], cfg['head_dim']
    HD = H * dh

    # ---- embeddings (table gathers are glue) ----
    X = params['word_emb'][input_ids] + params['pos_emb'][:n][None, :, :]

    # ---- tree construction (one-time glue, matches Model.forward) ----
    L_model, L_rel_m, L_ind_m = build_levels(n, k)
    n_tot = int(L_ind_m[-1])
    n_v = n_tot - n
    X = jnp.concatenate([X, jnp.zeros((b, n_v, d), jnp.float32)], axis=1)

    # virtual embeddings: mean of children, bottom-up
    for l in range(1, L_model + 1):
        Nq = L_rel_m[l + 1]
        children = (int(L_ind_m[l - 1]) + np.asarray(
            [[min(i * k + c, L_rel_m[l] - 1) for c in range(k)] for i in range(Nq)],
            dtype=np.int32))
        Xc = X[:, children, :]
        X = X.at[:, int(L_ind_m[l]):int(L_ind_m[l + 1]), :].set(jnp.mean(Xc, axis=2))

    # virtual sinusoidal positional encodings + zeroed level-flag column
    for l in range(1, L_model + 1):
        Nq = L_rel_m[l + 1]
        position = (0.5 + np.arange(Nq, dtype=np.float64))[:, None] * (n / Nq)
        div_term = np.exp(np.arange(0, d, 2, dtype=np.float64)
                          * -(math.log(10000.0) / d))
        pe = np.stack([np.sin(position * div_term),
                       np.cos(position * div_term)], -1).reshape(Nq, -1)
        seg = X[:, int(L_ind_m[l]):int(L_ind_m[l + 1]), :] + jnp.asarray(pe, jnp.float32)
        seg = seg.at[:, :, -l].set(0.0)
        X = X.at[:, int(L_ind_m[l]):int(L_ind_m[l + 1]), :].set(seg)

    # ---- static attention structure (shared by all layers) ----
    (L_attn, L_rel_a, L_ind_a, n_tot_a,
     bias_stack, level_slices) = build_attention_bias(n, k)
    assert n_tot_a == n_tot
    attn_kernel = _make_sequoia_kernel(b, n_tot, H, dh, L_ind_a, L_rel_a,
                                       level_slices, 1.0 / math.sqrt(dh))

    # ---- flatten rows once; single pad to a multiple of 16 so row kernels can
    #      use a 2-way 'parallel' grid (both TensorCores on v7x) ----
    M = b * n_tot
    Mp = ((M + 15) // 16) * 16
    Xp = X.reshape(M, d)
    if Mp != M:
        Xp = jnp.pad(Xp, ((0, Mp - M), (0, 0)))

    # TODO(synk): all dropout layers (embedding/attention/MLP) are inference no-ops.
    for p in params['layers']:
        # (1) LN1 + fused Q|K|V projection            -> (Mp, 3*HD)
        qkv = _row_blocked_call(
            functools.partial(_ln_matmul_kernel, eps=_EPS),
            [Xp],
            [p['ln1_g'].reshape(1, d), p['ln1_b'].reshape(1, d),
             p['Wqkv'], p['bqkv'].reshape(1, 3 * HD)],
            3 * HD)

        # (2) whole bottom-up Sequoia attention in ONE kernel -> (Mp, HD)
        attn = pl.pallas_call(
            attn_kernel,
            out_shape=jax.ShapeDtypeStruct((Mp, HD), jnp.float32),
        )(qkv, bias_stack)

        # (3) out-proj + residual + LN2 + MLP(GELU) + residual -> (Mp, d)
        Xp = _row_blocked_call(
            functools.partial(_out_mlp_kernel, eps=_EPS),
            [attn, Xp],
            [p['Wff'], p['bff'].reshape(1, d),
             p['ln2_g'].reshape(1, d), p['ln2_b'].reshape(1, d),
             p['W1'], p['b1'].reshape(1, hid),
             p['W2'], p['b2'].reshape(1, d)],
            d)

    # final LayerNorm; probe_layer == 'true' keeps the real (leaf) tokens
    Xn = _row_blocked_call(
        functools.partial(_final_ln_kernel, eps=_EPS),
        [Xp],
        [params['norm_g'].reshape(1, d), params['norm_b'].reshape(1, d)],
        d)
    return Xn[:M].reshape(b, n_tot, d)[:, :n, :]


# ----------------------------------------------------------------------------
# deterministic parameter init (synthetic; shapes follow the nn.Module)
# ----------------------------------------------------------------------------
def init_params(cfg, key):
    d = cfg['transformer_dim']
    hid = cfg['transformer_hidden_dim']
    H, dh = cfg['num_head'], cfg['head_dim']
    HD = H * dh
    keys = list(jax.random.split(key, 8 + 12 * cfg['num_layers']))
    it = iter(keys)

    def nrm(shape, std=0.02):
        return (std * jax.random.normal(next(it), shape)).astype(jnp.float32)

    params = {
        'word_emb': nrm((cfg['vocab_size'], d)),
        'pos_emb': nrm((cfg['max_seq_len'], d)),
        'norm_g': jnp.ones((d,), jnp.float32),
        'norm_b': jnp.zeros((d,), jnp.float32),
        'layers': [],
    }
    for _ in range(cfg['num_layers']):
        # Linear weights stored pre-transposed as (in, out); W_q|W_k|W_v fused.
        params['layers'].append({
            'ln1_g': jnp.ones((d,), jnp.float32), 'ln1_b': jnp.zeros((d,), jnp.float32),
            'ln2_g': jnp.ones((d,), jnp.float32), 'ln2_b': jnp.zeros((d,), jnp.float32),
            'Wqkv': nrm((d, 3 * HD)), 'bqkv': nrm((3 * HD,)),
            'Wff': nrm((HD, d)), 'bff': nrm((d,)),
            'W1': nrm((d, hid)), 'b1': nrm((hid,)),
            'W2': nrm((hid, d)), 'b2': nrm((d,)),
        })
    return params


# ----------------------------------------------------------------------------
if __name__ == "__main__":
    key = jax.random.PRNGKey(0)
    k_params, k_data = jax.random.split(key)
    params = init_params(config, k_params)

    batch, seq_len = 2, 16
    input_ids = jax.random.randint(k_data, (batch, seq_len), 0,
                                   config['vocab_size'], dtype=jnp.int32)

    out = model_forward(params, input_ids, config)
    out = jax.block_until_ready(out)

    assert out.shape == (batch, seq_len, config['transformer_dim']), out.shape
    assert bool(jnp.all(jnp.isfinite(out)))
    print("KERNEL_OK")
</pallas_src>

<mosaic_0001>
module attributes {stable_mosaic.version = 11 : i64} {
  func.func @_ln_matmul_kernel(%arg0: i32, %arg1: memref<32x128xf32, #tpu.memory_space<vmem>>, %arg2: memref<1x128xf32, #tpu.memory_space<vmem>>, %arg3: memref<1x128xf32, #tpu.memory_space<vmem>>, %arg4: memref<128x384xf32, #tpu.memory_space<vmem>>, %arg5: memref<1x384xf32, #tpu.memory_space<vmem>>, %arg6: memref<32x384xf32, #tpu.memory_space<vmem>>) attributes {dimension_semantics = [#tpu.dimension_semantics<parallel>], iteration_bounds = array<i64: 2>, scalar_prefetch = 0 : i64, scratch_operands = 0 : i64, tpu.core_type = #tpu.core_type<tc>, window_params = [{transform_indices = @transform_0, window_bounds = array<i64: 32, 128>}, {pipeline_mode = #tpu.pipeline_mode<synchronous>, transform_indices = @transform_1, window_bounds = array<i64: 1, 128>}, {pipeline_mode = #tpu.pipeline_mode<synchronous>, transform_indices = @transform_2, window_bounds = array<i64: 1, 128>}, {pipeline_mode = #tpu.pipeline_mode<synchronous>, transform_indices = @transform_3, window_bounds = array<i64: 128, 384>}, {pipeline_mode = #tpu.pipeline_mode<synchronous>, transform_indices = @transform_4, window_bounds = array<i64: 1, 384>}, {transform_indices = @transform_5, window_bounds = array<i64: 32, 384>}]} {
    %c0 = arith.constant 0 : index
    %c0_0 = arith.constant 0 : index
    %0 = vector.load %arg1[%c0, %c0_0] : memref<32x128xf32, #tpu.memory_space<vmem>>, vector<32x128xf32>
    %cst = arith.constant dense<0.000000e+00> : vector<32xf32>
    %1 = vector.multi_reduction <add>, %0, %cst [1] : vector<32x128xf32> to vector<32xf32>
    %2 = vector.shape_cast %1 : vector<32xf32> to vector<32x1xf32>
    %cst_1 = arith.constant 1.280000e+02 : f32
    %3 = vector.broadcast %cst_1 : f32 to vector<32x1xf32>
    %4 = arith.divf %2, %3 : vector<32x1xf32>
    %5 = vector.broadcast %4 : vector<32x1xf32> to vector<32x128xf32>
    %6 = arith.subf %0, %5 : vector<32x128xf32>
    %7 = arith.mulf %6, %6 : vector<32x128xf32>
    %cst_2 = arith.constant dense<0.000000e+00> : vector<32xf32>
    %8 = vector.multi_reduction <add>, %7, %cst_2 [1] : vector<32x128xf32> to vector<32xf32>
    %9 = vector.shape_cast %8 : vector<32xf32> to vector<32x1xf32>
    %cst_3 = arith.constant 1.280000e+02 : f32
    %10 = vector.broadcast %cst_3 : f32 to vector<32x1xf32>
    %11 = arith.divf %9, %10 : vector<32x1xf32>
    %cst_4 = arith.constant 9.99999974E-6 : f32
    %12 = vector.broadcast %cst_4 : f32 to vector<32x1xf32>
    %13 = arith.addf %11, %12 : vector<32x1xf32>
    %14 = math.rsqrt %13 : vector<32x1xf32>
    %15 = vector.broadcast %14 : vector<32x1xf32> to vector<32x128xf32>
    %16 = arith.mulf %6, %15 : vector<32x128xf32>
    %c0_5 = arith.constant 0 : index
    %c0_6 = arith.constant 0 : index
    %17 = vector.load %arg2[%c0_5, %c0_6] : memref<1x128xf32, #tpu.memory_space<vmem>>, vector<1x128xf32>
    %18 = vector.broadcast %17 : vector<1x128xf32> to vector<32x128xf32>
    %19 = arith.mulf %16, %18 : vector<32x128xf32>
    %c0_7 = arith.constant 0 : index
    %c0_8 = arith.constant 0 : index
    %20 = vector.load %arg3[%c0_7, %c0_8] : memref<1x128xf32, #tpu.memory_space<vmem>>, vector<1x128xf32>
    %21 = vector.broadcast %20 : vector<1x128xf32> to vector<32x128xf32>
    %22 = arith.addf %19, %21 : vector<32x128xf32>
    %c0_9 = arith.constant 0 : index
    %c0_10 = arith.constant 0 : index
    %23 = vector.load %arg4[%c0_9, %c0_10] : memref<128x384xf32, #tpu.memory_space<vmem>>, vector<128x384xf32>
    %cst_11 = arith.constant dense<0.000000e+00> : vector<32x384xf32>
    %24 = tpu.matmul %22, %23, %cst_11 {dimension_numbers = #tpu.dot_dimension_numbers<[1], [0], [0], [1], [0, 0, 1, 1], [], []>} : vector<32x128xf32>, vector<128x384xf32>, vector<32x384xf32> -> vector<32x384xf32>
    %c0_12 = arith.constant 0 : index
    %c0_13 = arith.constant 0 : index
    %25 = vector.load %arg5[%c0_12, %c0_13] : memref<1x384xf32, #tpu.memory_space<vmem>>, vector<1x384xf32>
    %26 = vector.broadcast %25 : vector<1x384xf32> to vector<32x384xf32>
    %27 = arith.addf %24, %26 : vector<32x384xf32>
    %c0_14 = arith.constant 0 : index
    %c0_15 = arith.constant 0 : index
    %28 = vector.load %arg6[%c0_14, %c0_15] : memref<32x384xf32, #tpu.memory_space<vmem>>, vector<32x384xf32>
    tpu.vector_store %arg6[%c0_14, %c0_15], %27 {strides = array<i32>} : memref<32x384xf32, #tpu.memory_space<vmem>>, vector<32x384xf32>,
    return
  }
  func.func @transform_0(%arg0: i32) -> (i32, i32) {
    %c0_i32 = arith.constant 0 : i32
    %c0_i32_0 = arith.constant 0 : i32
    return %arg0, %c0_i32 : i32, i32
  }
  func.func @transform_1(%arg0: i32) -> (i32, i32) {
    %c0_i32 = arith.constant 0 : i32
    %c0_i32_0 = arith.constant 0 : i32
    %c0_i32_1 = arith.constant 0 : i32
    return %c0_i32, %c0_i32_0 : i32, i32
  }
  func.func @transform_2(%arg0: i32) -> (i32, i32) {
    %c0_i32 = arith.constant 0 : i32
    %c0_i32_0 = arith.constant 0 : i32
    %c0_i32_1 = arith.constant 0 : i32
    return %c0_i32, %c0_i32_0 : i32, i32
  }
  func.func @transform_3(%arg0: i32) -> (i32, i32) {
    %c0_i32 = arith.constant 0 : i32
    %c0_i32_0 = arith.constant 0 : i32
    %c0_i32_1 = arith.constant 0 : i32
    return %c0_i32, %c0_i32_0 : i32, i32
  }
  func.func @transform_4(%arg0: i32) -> (i32, i32) {
    %c0_i32 = arith.constant 0 : i32
    %c0_i32_0 = arith.constant 0 : i32
    %c0_i32_1 = arith.constant 0 : i32
    return %c0_i32, %c0_i32_0 : i32, i32
  }
  func.func @transform_5(%arg0: i32) -> (i32, i32) {
    %c0_i32 = arith.constant 0 : i32
    %c0_i32_0 = arith.constant 0 : i32
    return %arg0, %c0_i32 : i32, i32
  }
}

</mosaic_0001>

<bundles_post_ra>
// kernel: tpu_custom_call.1
= control target key start
LH: loop header
LB: loop body
LE: loop exit
PB: predicated region body
PF: predicated region fallthrough
CT: control target
= control target key end

     0   :  { %10 = vsyncpa [#allocation3], 0  ;;  %s1314_s0 = inlined_call_operand.hbm [shape: f32[64,128], index: 0, kind: input, shape index: {}]   ;;  %s1315_s1 = inlined_call_operand.vmem [shape: f32[1,128], index: 1, kind: input, shape index: {}]   ;;  %s1316_s2 = inlined_call_operand.vmem [shape: f32[1,128], index: 2, kind: input, shape index: {}]   ;;  %s1317_s3 = inlined_call_operand.hbm [shape: f32[128,384], index: 3, kind: input, shape index: {}]   ;;  %s1318_s4 = inlined_call_operand.vmem [shape: f32[1,384], index: 4, kind: input, shape index: {}]   ;;  %s1319_s5 = inlined_call_operand.hbm [shape: f32[64,384], index: 5, kind: output, shape index: {}]  }
   0x1   :  { %12 = vsyncpa [#allocation3 + $0x1], 0 }
   0x2   :  { %13 = vsyncpa [#allocation6], 0 }
   0x3   :  { %14 = vsyncpa [#allocation4], 0 }
   0x4   :  { %16 = vsyncpa [#allocation4 + $0x1], 0  ;;  %s1064_s18 = smov 0   ;;  %s1066_s19 = smov 0  }
   0x5   :  { %s1068_s20 = smov 0   ;;  %s1070_s21 = smov 0  }
   0x6 LB: > { %s1085_s22 = sadd.s32 4294967295, %s1022_s21   ;;  %s680_s23 = sadd.s32 4294967294, %s1022_s21   ;;  %s1022_s21 = sphi %s1070_s21, %s1339_s21   ;;  %s1018_s20 = sphi %s1068_s20, %s1338_s20   ;;  %s1014_s19 = sphi %s1066_s19, %s1337_s19   ;;  %s1010_s18 = sphi %s1064_s18, %s1336_s18  }
   0x7   : > { %p42_p0 = scmp.ne.s32.totalorder %s1014_s19, %s1010_s18  ;;  %p1320_p1 = scmp.eq.s32.totalorder %s1085_s22, 0 }
   0x8   : > { %p156_p3 = scmp.eq.s32.totalorder %s680_s23, 1  ;;  %p681_p5 = scmp.ge.s32.totalorder %s1022_s21, 1 }
   0x9   : > { %p1094_p4 = por %p1320_p1, %p42_p0  ;;  %p163_p7 = scmp.lt.s32.totalorder %s1022_s21, 3 }
   0xa   : > { %p1099_p6 = por %p156_p3, %p42_p0  ;;  %s1024_s27 = smov [#allocation5]  }
   0xb   : > { %s1323_s24 = scalar_select %p1094_p4, 1, 0 }
   0xc   : > { %s1324_s25 = scalar_select %p1099_p6, 1, 0 }
   0xd   : > { %p1104_p8 = pnand %p681_p5, %p163_p7  ;;  %s181_s28 = sshll.u32 %s1024_s27, 4  ;;  %s1108_s28 = int_to_ptr.vmem [resolvable:$true] %s181_s28 }
   0xe   : > { %s1120_s30 = sadd.s32 1, %s1022_s21   ;;  %s29_s6 = sadd.s32 1, %s1018_s20 }
   0xf   : > { %s1325_s26 = scalar_select %p1104_p8, 1, 0 }
  0x10   : > { %p830_p9 = pneg %p1104_p8  ;;  %s26_s7 = ssub.s32 %s1022_s21, %s1120_s30 }
  0x11   : > { %s894_s10 = scalar_lea.hbm %s1317_s3, 6144 }
  0x12   : > { %p1115_p11 = pnand %p830_p9, %p1320_p1  ;;  %p895_p12 = scmp.ne.s32.totalorder %s1317_s3, %s894_s10 }
  0x13   : > { %p901_p5 = scmp.lt.u32.totalorder %s894_s10, %s1317_s3 }
  0x14   : > { %p896_p13 = pneg %p1115_p11 }
  0x16   : > { %p897_p0 = pnand %p896_p13, %p895_p12 }
  0x18   : > { %p898_p3 = pneg %p897_p0 }
  0x1a   : > { %p903_p7 = pnand %p901_p5, %p898_p3 }
  0x1c   : > { %906 = shalt.err (!%p903_p7)
}
  0x1d   : > { %s907_s15 = scalar_lea.vmem %s1108_s28, 6144  ;;  %p915_p2 = scmp.lt.s32.totalorder %s1108_s28, %s1108_s28 }
  0x1e   : > { %p908_p9 = scmp.ne.s32.totalorder %s1108_s28, %s907_s15  ;;  %p916_p6 = scmp.lt.s32.totalorder %s907_s15, %s907_s15 }
  0x20   : > { %p910_p10 = pnand %p908_p9, %p896_p13  ;;  %p917_p4 = por %p916_p6, %p915_p2 }
  0x22   : > { %p911_p1 = pneg %p910_p10 }
  0x24   : > { %p918_p8 = pnand %p917_p4, %p911_p1 }
  0x26   : > { %921 = shalt.err (!%p918_p8)
}
  0x27   : > { %s1025_s16 = smov 384   ;;  %s1026_s17 = smov 24  }
  0x28   : > { %833 = dma.hbm_to_vmem [thread:$0]  (!%p1115_p11), %s1317_s3, 6144, %s1108_s28, [#allocation6], %s1025_s16, %s1025_s16, %s1026_s17  }
  0x29   : > { %p27_p2 = scmp.eq.s32.totalorder %s26_s7, 0  ;;  %p36_p1 = scmp.ne.s32.totalorder %s1018_s20, %s1014_s19 }
  0x2a   : > { %p37_p4 = scmp.eq.s32.totalorder %s1022_s21, 0  ;;  %p843_p6 = scmp.lt.s32.totalorder %s1022_s21, 2 }
  0x2b   : > { %s1151_s8 = scalar_select %p27_p2, %s1018_s20, %s29_s6  }
  0x2c   : > { %p38_p8 = por %p37_p4, %p36_p1  ;;  %p1327_p10 = scmp.eq.s32.totalorder %s1085_s22, 1 }
  0x2d   : > { %s198_s10 = sand.u32 1, %s1018_s20   ;;  %s697_s11 = sshll.u32 %s1022_s21, 9 }
  0x2e   : > { %p1155_p12 = por %p1327_p10, %p36_p1  ;;  %s684_s12 = sshll.u32 %s198_s10, 5 }
  0x2f   : > { %s1164_s14 = scalar_lea.hbm %s1314_s0, %s697_s11  ;;  %s202_s28 = scalar_lea.vmem [#allocation2], %s684_s12 }
  0x30   : > { %s209_s6 = sshll.u32 %s202_s28, 4  ;;  %p1166_p11 = pnand %p843_p6, %p38_p8  ;;  %s1170_s6 = int_to_ptr.vmem [resolvable:$true] %s209_s6 }
  0x31   : > { %s1172_s15 = scalar_lea.sflag [#allocation3], %s198_s10  ;;  %s922_s16 = scalar_lea.hbm %s1164_s14, 512 }
  0x32   : > { %p923_p13 = scmp.ne.s32.totalorder %s1164_s14, %s922_s16  ;;  %p924_p0 = pneg %p1166_p11 }
  0x33   : > { %s927_s27 = scalar_lea.hbm %s1314_s0, 1024  ;;  %p928_p7 = scmp.lt.u32.totalorder %s1164_s14, %s1314_s0 }
  0x34   : > { %p925_p3 = pnand %p924_p0, %p923_p13  ;;  %p929_p9 = scmp.lt.u32.totalorder %s927_s27, %s922_s16 }
  0x35   : > { %p931_p1 = scmp.lt.u32.totalorder %s922_s16, %s1164_s14 }
  0x36   : > { %p926_p5 = pneg %p925_p3  ;;  %p930_p2 = por %p929_p9, %p928_p7 }
  0x38   : > { %p932_p4 = por %p931_p1, %p930_p2 }
  0x3a   : > { %p933_p6 = pnand %p932_p4, %p926_p5 }
  0x3c   : > { %936 = shalt.err (!%p933_p6)
}
  0x3d   : > { %s937_s10 = scalar_lea.vmem %s1170_s6, 512  ;;  %s1027_s29 = smov [#allocation2]  }
  0x3e   : > { %p938_p8 = scmp.ne.s32.totalorder %s1170_s6, %s937_s10  ;;  %s942_s13 = sshll.u32 %s1027_s29, 4  ;;  %s943_s13 = int_to_ptr.vmem [resolvable:$false] %s942_s13 }
  0x3f   : > { %s944_s28 = scalar_lea.vmem %s943_s13, 1024  ;;  %p945_p3 = scmp.lt.s32.totalorder %s1170_s6, %s943_s13 }
  0x40   : > { %p940_p10 = pnand %p938_p8, %p924_p0  ;;  %p946_p7 = scmp.lt.s32.totalorder %s944_s28, %s937_s10 }
  0x42   : > { %p941_p13 = pneg %p940_p10  ;;  %p947_p9 = por %p946_p7, %p945_p3 }
  0x44   : > { %p948_p2 = pnand %p947_p9, %p941_p13 }
  0x46   : > { %951 = shalt.err (!%p948_p2)
}
  0x47   : > { %s1028_s16 = smov 128   ;;  %s1029_s17 = smov 8  }
  0x48   : > { %837 = dma.hbm_to_vmem [thread:$0]  (!%p1166_p11), %s1164_s14, 512, %s1170_s6, %s1172_s15, %s1028_s16, %s1028_s16, %s1029_s17  }
  0x49   : > { %p1330_p0 = scmp.ne.s32.totalorder %s1325_s26, 0 }
  0x4a   : > { %s1203_s23 = sand.u32 (!%p1330_p0), 1, %s1014_s19   ;;  %p1331_p5 = scmp.ne.s32.totalorder (!%p1330_p0), %s1323_s24, 0 }
  0x4b   : > { %221 = sbr.rel (%p1330_p0) target bundleno = 640 (0x280), region = 40  ;;  %s688_s27 = sshll.u32 (!%p1330_p0), %s1203_s23, 5 }
  0x4c   : > { %s224_s11 = scalar_lea.sflag (!%p1330_p0), [#allocation3], %s1203_s23  ;;  %s227_s12 = scalar_lea.vmem (!%p1330_p0), [#allocation2], %s688_s27 }
  0x52   : > { %997 = dma.done.wait (%p1331_p5), %s224_s11, 512  }
  0x53   : > { %999 = vsyncadd (%p1331_p5), %s224_s11, 4294966784  ;;  %p1332_p1 = scmp.eq.s32.totalorder %s1085_s22, 0 }
  0x55   : > { %1001 = dma.done.wait (%p1332_p1), [#allocation6], 6144   ;;  %p1333_p11 = pmov %p1332_p1 }
  0x56   : > { %v260_v0 = vld [vmem:[%s227_s12] sm:$0xff]  ;;  %v262_v1 = vld [vmem:[%s227_s12 + $0x10] sm:$0xff]  ;;  %v261_v2 = vld [vmem:[%s227_s12 + $0x8] sm:$0xff]  ;;  %s820_s10 = smul.u32 96, %s1203_s23 }
  0x57   : > { %1003 = vsyncadd (%p1333_p11), [#allocation6], 4294961152  ;;  %264 = vadd.xlane.f32.xlu0 %v260_v0  ;;  %268 = vadd.xlane.f32.xlu1 %v262_v1  ;;  %v263_v3 = vld [vmem:[%s227_s12 + $0x18] sm:$0xff]  ;;  %v332_v4 = vld [vmem:[#allocation5 + $0x8] sm:$0xff]  ;;  %s821_s13 = smul.u32 1536, %s1085_s22  ;;  %s583_s22 = scalar_lea.sflag [#allocation4], %s1203_s23 }
  0x58   : > { %v335_v5 = vld [vmem:[#allocation5 + $0x20] sm:$0xff]  ;;  %v334_v8 = vld [vmem:[#allocation5 + $0x18] sm:$0xff]  ;;  %v341_v10 = vld [vmem:[#allocation5 + $0x50] sm:$0xff]  ;;  %s1249_s29 = scalar_lea.vmem [#allocation7], %s820_s10  ;;  %s1031_s12 = smov [#allocation7]  }
  0x59   : > { %v331_v6 = vld [vmem:[#allocation5] sm:$0xff]  ;;  %v756_v7 = vpack.c.bf16 %v335_v5, %v332_v4  ;;  %v338_v9 = vld [vmem:[#allocation5 + $0x38] sm:$0xff]  ;;  %v333_v13 = vld [vmem:[#allocation5 + $0x10] sm:$0xff]  ;;  %s597_s28 = sshll.u32 %s1249_s29, 4  ;;  %s1266_s27 = scalar_lea.hbm %s1319_s5, %s821_s13  ;;  %s1268_s28 = int_to_ptr.vmem [resolvable:$true] %s597_s28 }
  0x5a   : > { %v758_v11 = vpack.c.bf16 %v334_v8, %v331_v6  ;;  %v760_v12 = vpack.c.bf16 %v341_v10, %v338_v9  ;;  %v336_v14 = vld [vmem:[#allocation5 + $0x28] sm:$0xff]  ;;  %v337_v15 = vld [vmem:[#allocation5 + $0x30] sm:$0xff]  ;;  %v347_v19 = vld [vmem:[#allocation5 + $0x80] sm:$0xff]  ;;  %s952_s11 = scalar_lea.vmem %s1268_s28, 1536  ;;  %s956_s24 = sshll.u32 %s1031_s12, 4  ;;  %s957_s24 = int_to_ptr.vmem [resolvable:$false] %s956_s24 }
  0x5b   : > { %266 = vadd.xlane.f32.xlu0 %v261_v2  ;;  %270 = vadd.xlane.f32.xlu1 %v263_v3  ;;  %v788_v16 = vpack.c.bf16 %v336_v14, %v333_v13  ;;  %v340_v17 = vld [vmem:[#allocation5 + $0x48] sm:$0xff]  ;;  %v339_v21 = vld [vmem:[#allocation5 + $0x40] sm:$0xff]  ;;  %v342_v22 = vld [vmem:[#allocation5 + $0x58] sm:$0xff]  ;;  %p953_p4 = scmp.ne.s32.totalorder %s1268_s28, %s952_s11  ;;  %s958_s26 = scalar_lea.vmem %s957_s24, 3072 }
  0x5c   : > { %757 = vmatprep.subr.bf16.mxu0 %v756_v7  ;;  %v344_v18 = vld [vmem:[#allocation5 + $0x68] sm:$0xff]  ;;  %v762_v20 = vpack.c.bf16 %v340_v17, %v337_v15  ;;  %v792_v24 = vpack.c.bf16 %v342_v22, %v339_v21  ;;  %v343_v25 = vld [vmem:[#allocation5 + $0x60] sm:$0xff]  ;;  %v346_v26 = vld [vmem:[#allocation5 + $0x78] sm:$0xff]  ;;  %p959_p10 = scmp.lt.s32.totalorder %s1268_s28, %s957_s24  ;;  %p960_p13 = scmp.lt.s32.totalorder %s958_s26, %s952_s11 }
  0x5d   : > { %759 = vmatpush1.bf16.msra.mxu0 %v758_v11  ;;  %789 = vmatprep.subr.bf16.mxu1 %v788_v16  ;;  %v764_v23 = vpack.c.bf16 %v347_v19, %v344_v18  ;;  %v766_v27 = vpack.c.bf16 %v346_v26, %v343_v25  ;;  %v350_v44 = vld [vmem:[#allocation5 + $0x98] sm:$0xff]  ;;  %v353_v45 = vld [vmem:[#allocation5 + $0xb0] sm:$0xff]  ;;  %v348_v48 = vld [vmem:[#allocation5 + $0x88] sm:$0xff]  ;;  %v1030_v19 = vmov 0.0   ;;  %p954_p6 = pnand %p953_p4, %p1155_p12 }
  0x5e   : > { %761 = vmatprep.subr.bf16.mxu0 %v760_v12  ;;  %791 = vmatpush3.bf16.msra.mxu1 %v788_v16  ;;  %v345_v46 = vld [vmem:[#allocation5 + $0x70] sm:$0xff]  ;;  %v768_v47 = vpack.c.bf16 %v353_v45, %v350_v44  ;;  %v352_v50 = vld [vmem:[#allocation5 + $0xa8] sm:$0xff]  ;;  %v359_v54 = vld [vmem:[#allocation5 + $0xe0] sm:$0xff]  ;;  %p961_p3 = por %p960_p13, %p959_p10 }
  0x5f   : > { %793 = vmatprep.subr.bf16.mxu1 %v792_v24  ;;  %v349_v49 = vld [vmem:[#allocation5 + $0x90] sm:$0xff]  ;;  %v796_v51 = vpack.c.bf16 %v348_v48, %v345_v46  ;;  %v356_v53 = vld [vmem:[#allocation5 + $0xc8] sm:$0xff]  ;;  %v351_v55 = vld [vmem:[#allocation5 + $0xa0] sm:$0xff]  ;;  %460 = vmatprep.mubr.f32.mxu0 %v1030_v19  ;;  %p955_p8 = pneg %p954_p6 }
  0x60   : > { %v770_v52 = vpack.c.bf16 %v352_v50, %v349_v49  ;;  %v772_v56 = vpack.c.bf16 %v359_v54, %v356_v53  ;;  %v354_v57 = vld [vmem:[#allocation5 + $0xb8] sm:$0xff]  ;;  %v355_v58 = vld [vmem:[#allocation5 + $0xc0] sm:$0xff]  ;;  %v365_v63 = vld [vmem:[#allocation5 + $0x110] sm:$0xff] }
  0x61   : > { %763 = vmatpush1.bf16.msra.mxu0 %v762_v20  ;;  %v358_v59 = vld [vmem:[#allocation5 + $0xd8] sm:$0xff]  ;;  %v800_v60 = vpack.c.bf16 %v354_v57, %v351_v55  ;;  %v364_v4 = vld [vmem:[#allocation5 + $0x108] sm:$0xff]  ;;  %v371_v8 = vld [vmem:[#allocation5 + $0x140] sm:$0xff]  ;;  %p962_p7 = pnand %p961_p3, %p955_p8 }
  0x62   : > { %765 = vmatprep.subr.bf16.mxu0 %v764_v23  ;;  %795 = vmatpush3.bf16.msra.mxu1 %v792_v24  ;;  %v774_v61 = vpack.c.bf16 %v358_v59, %v355_v58  ;;  %v362_v62 = vld [vmem:[#allocation5 + $0xf8] sm:$0xff]  ;;  %v368_v7 = vld [vmem:[#allocation5 + $0x128] sm:$0xff]  ;;  %v363_v9 = vld [vmem:[#allocation5 + $0x100] sm:$0xff] }
  0x63   : > { %797 = vmatprep.subr.bf16.mxu1 %v796_v51  ;;  %v780_v10 = vpack.c.bf16 %v371_v8, %v368_v7  ;;  %v366_v11 = vld [vmem:[#allocation5 + $0x118] sm:$0xff]  ;;  %v367_v12 = vld [vmem:[#allocation5 + $0x120] sm:$0xff]  ;;  %v377_v17 = vld [vmem:[#allocation5 + $0x170] sm:$0xff] }
  0x64   : > { %v370_v13 = vld [vmem:[#allocation5 + $0x138] sm:$0xff]  ;;  %v808_v14 = vpack.c.bf16 %v366_v11, %v363_v9  ;;  %v369_v18 = vld [vmem:[#allocation5 + $0x130] sm:$0xff]  ;;  %v372_v21 = vld [vmem:[#allocation5 + $0x148] sm:$0xff] }
  0x65   : > { %767 = vmatpush1.bf16.msra.mxu0 %v766_v27  ;;  %v782_v15 = vpack.c.bf16 %v370_v13, %v367_v12  ;;  %v374_v16 = vld [vmem:[#allocation5 + $0x158] sm:$0xff]  ;;  %v373_v22 = vld [vmem:[#allocation5 + $0x150] sm:$0xff]  ;;  %v376_v23 = vld [vmem:[#allocation5 + $0x168] sm:$0xff]  ;;  %v812_v24 = vpack.c.bf16 %v372_v21, %v369_v18 }
  0x66   : > { %769 = vmatprep.subr.bf16.mxu0 %v768_v47  ;;  %799 = vmatpush3.bf16.msra.mxu1 %v796_v51  ;;  %v784_v20 = vpack.c.bf16 %v377_v17, %v374_v16  ;;  %v786_v25 = vpack.c.bf16 %v376_v23, %v373_v22  ;;  %v375_v26 = vld [vmem:[#allocation5 + $0x160] sm:$0xff]  ;;  %v378_v27 = vld [vmem:[#allocation5 + $0x178] sm:$0xff] }
  0x67   : > { %801 = vmatprep.subr.bf16.mxu1 %v800_v60  ;;  %v690_v46 = vld [vmem:[%s1315_s1] ss:$0 sm:$0xff] }
  0x68   : > { %v691_v48 = vld [vmem:[%s1316_s2] ss:$0 sm:$0xff] }
  0x69   : > { %771 = vmatpush1.bf16.msra.mxu0 %v770_v52 }
  0x6a   : > { %773 = vmatprep.subr.bf16.mxu0 %v772_v56  ;;  %803 = vmatpush3.bf16.msra.mxu1 %v800_v60 }
  0x6d   : > { %775 = vmatpush1.bf16.msra.mxu0 %v774_v61 }
  0xe4   : > { %v265_v28 = vpop.xlane.xlu0 %264  ;;  %v269_v29 = vpop.xlane.xlu1 %268 }
  0xe5   : > { %v273_v30 = vmul.f32 0.0078125, %v265_v28  ;;  %v275_v31 = vmul.f32 0.0078125, %v269_v29  ;;  %v816_v28 = vpack.c.bf16 %v378_v27, %v375_v26 }
  0xe7   : > { %v1215_v32 = vsub.f32 %v260_v0, %v273_v30  ;;  %v1217_v33 = vsub.f32 %v262_v1, %v275_v31  ;;  %v357_v0 = vld [vmem:[#allocation5 + $0xd0] sm:$0xff]  ;;  %v776_v1 = vpack.c.bf16 %v365_v63, %v362_v62 }
  0xe8   : > { %v267_v34 = vpop.xlane.xlu0 %266  ;;  %v271_v35 = vpop.xlane.xlu1 %270 }
  0xe9   : > { %v274_v36 = vmul.f32 0.0078125, %v267_v34  ;;  %v281_v37 = vmul.f32 %v1215_v32, %v1215_v32  ;;  %v276_v38 = vmul.f32 0.0078125, %v271_v35  ;;  %v283_v41 = vmul.f32 %v1217_v33, %v1217_v33  ;;  %777 = vmatprep.subr.bf16.mxu0 %v776_v1 }
  0xeb   : > { %v1221_v39 = vsub.f32 %v261_v2, %v274_v36  ;;  %285 = vadd.xlane.f32.xlu0 %v281_v37  ;;  %v1223_v40 = vsub.f32 %v263_v3, %v276_v38  ;;  %v360_v2 = vld [vmem:[#allocation5 + $0xe8] sm:$0xff]  ;;  %v361_v3 = vld [vmem:[#allocation5 + $0xf0] sm:$0xff] }
  0xec   : > { %v804_v5 = vpack.c.bf16 %v360_v2, %v357_v0  ;;  %v778_v6 = vpack.c.bf16 %v364_v4, %v361_v3 }
  0xed   : > { %v282_v42 = vmul.f32 %v1221_v39, %v1221_v39  ;;  %v284_v43 = vmul.f32 %v1223_v40, %v1223_v40 }
  0xee   : > { %805 = vmatprep.subr.bf16.mxu1 %v804_v5  ;;  %779 = vmatpush1.bf16.msra.mxu0 %v778_v6 }
  0xef   : > { %289 = vadd.xlane.f32.xlu0 %v283_v41  ;;  %287 = vadd.xlane.f32.xlu1 %v282_v42 }
  0xf0   : > { %807 = vmatpush3.bf16.msra.mxu1 %v804_v5  ;;  %781 = vmatprep.subr.bf16.mxu0 %v780_v10 }
  0xf1   : > { %809 = vmatprep.subr.bf16.mxu1 %v808_v14 }
  0xf2   : > { %783 = vmatpush1.bf16.msra.mxu0 %v782_v15 }
  0xf3   : > { %291 = vadd.xlane.f32.xlu1 %v284_v43  ;;  %785 = vmatprep.subr.bf16.mxu0 %v784_v20 }
  0xf4   : > { %811 = vmatpush3.bf16.msra.mxu1 %v808_v14 }
  0xf5   : > { %813 = vmatprep.subr.bf16.mxu1 %v812_v24 }
  0xf6   : > { %787 = vmatpush1.bf16.msra.mxu0 %v786_v25 }
  0xf8   : > { %815 = vmatpush3.bf16.msra.mxu1 %v812_v24 }
  0xf9   : > { %817 = vmatprep.subr.bf16.mxu1 %v816_v28 }
  0xfc   : > { %819 = vmatpush3.bf16.msra.mxu1 %v816_v28 }
 0x178   : > { %v286_v29 = vpop.xlane.xlu0 %285 }
 0x179   : > { %v293_v30 = vmul.f32 0.0078125, %v286_v29 }
 0x17b   : > { %v297_v31 = vadd.f32 1e-05, %v293_v30 }
 0x17c   : > { %v288_v34 = vpop.xlane.xlu1 %287  ;;  %v290_v35 = vpop.xlane.xlu0 %289 }
 0x17d   : > { %886 = vrsqrt.f32 %v297_v31  ;;  %v294_v36 = vmul.f32 0.0078125, %v288_v34  ;;  %v295_v37 = vmul.f32 0.0078125, %v290_v35 }
 0x17f   : > { %v298_v38 = vadd.f32 1e-05, %v294_v36  ;;  %v299_v41 = vadd.f32 1e-05, %v295_v37 }
 0x180   : > { %v292_v42 = vpop.xlane.xlu1 %291 }
 0x181   : > { %888 = vrsqrt.f32 %v298_v38  ;;  %v296_v43 = vmul.f32 0.0078125, %v292_v42 }
 0x182   : > { %890 = vrsqrt.f32 %v299_v41 }
 0x183   : > { %v300_v44 = vadd.f32 1e-05, %v296_v43 }
 0x185   : > { %892 = vrsqrt.f32 %v300_v44 }
 0x187   : > { %v887_v45 = vpop.eup %886 }
 0x188   : > { %v305_v47 = vmul.f32 %v887_v45, %v1215_v32 }
 0x18a   : > { %v316_v49 = vmul.f32 %v690_v46, %v305_v47 }
 0x18b   : > { %v889_v50 = vpop.eup %888 }
 0x18c   : > { %v891_v51 = vpop.eup %890  ;;  %v327_v52 = vadd.f32 %v691_v48, %v316_v49  ;;  %v306_v53 = vmul.f32 %v889_v50, %v1221_v39 }
 0x18d   : > { %v307_v54 = vmul.f32 %v891_v51, %v1217_v33  ;;  %v381_v33 = vlaneseq }
 0x18e   : > { %461 = vmatmul.mubr.f32.vlgmr.msra.gmra.mrb[0].mxu0 %v327_v52  ;;  %750 = vmatprep.mubr.f32.mxu1 %v327_v52  ;;  %v317_v55 = vmul.f32 %v690_v46, %v306_v53 }
 0x18f   : > { %v893_v56 = vpop.eup %892  ;;  %466 = vmatprep.mubr.f32.mxu0 %v1030_v19  ;;  %v318_v57 = vmul.f32 %v690_v46, %v307_v54  ;;  %v382_v61 = vshrl.u32 %v381_v33, 7 }
 0x190   : > { %v328_v32 = vadd.f32 %v691_v48, %v317_v55  ;;  %v308_v58 = vmul.f32 %v893_v56, %v1223_v40  ;;  %v379_v40 = vld [vmem:[%s1318_s4] sm:$0x7] }
 0x191   : > { %v329_v59 = vadd.f32 %v691_v48, %v318_v57  ;;  %v383_v62 = vsub.s32 0, %v382_v61  ;;  %v387_v63 = vsub.s32 1, %v382_v61  ;;  %v391_v1 = vsub.s32 2, %v382_v61 }
 0x192   : > { %467 = vmatmul.mubr.f32.gmra.mrb[2].mxu0 %v328_v32  ;;  %751 = vmatmul.mubr.f32.vlgmr.msra.gmra.mrb[0].mxu1 %v328_v32  ;;  %v319_v60 = vmul.f32 %v690_v46, %v308_v58 }
 0x193   : > { %753 = vmatprep.mubr.f32.mxu1 %v329_v59  ;;  %472 = vmatprep.mubr.f32.mxu0 %v1030_v19  ;;  %v384_v0 = vrot.slane %v379_v40, %v383_v62  ;;  %v388_v2 = vrot.slane %v379_v40, %v387_v63  ;;  %v392_v6 = vrot.slane %v379_v40, %v391_v1 }
 0x194   : > { %v330_v39 = vadd.f32 %v691_v48, %v319_v60 }
 0x196   : > { %473 = vmatmul.mubr.f32.gmra.mrb[4].mxu0 %v329_v59  ;;  %754 = vmatmul.mubr.f32.gmra.mrb[2].mxu1 %v330_v39 }
 0x197   : > { %478 = vmatprep.mubr.f32.mxu0 %v1030_v19 }
 0x19a   : > { %479 = vmatmul.mubr.f32.gmra.mrb[6].mxu0 %v330_v39 }
 0x261   : > { %v462_v3 = vpop.f32.mrb[0].mxu0 }
 0x262   : > { %v463_v4 = vadd.f32 %v462_v3, %v384_v0  ;;  %v464_v5 = vpop.f32.mrb[1].mxu0 }
 0x263   : > { %v465_v7 = vadd.f32 %v464_v5, %v388_v2 }
 0x264   : > { %570 = vst [vmem:[%s1249_s29] sm:$0xff] %v463_v4 }
 0x265   : > { %571 = vst [vmem:[%s1249_s29 + $0x8] sm:$0xff] %v465_v7  ;;  %v468_v8 = vpop.f32.mrb[2].mxu0  ;;  %v752_v9 = vpop.f32.mrb[0].mxu1 }
 0x266   : > { %v469_v10 = vadd.f32 %v468_v8, %v384_v0  ;;  %v557_v11 = vadd.f32 %v752_v9, %v392_v6  ;;  %v470_v12 = vpop.f32.mrb[3].mxu0  ;;  %v551_v13 = vpop.f32.mrb[1].mxu1 }
 0x267   : > { %v471_v14 = vadd.f32 %v470_v12, %v388_v2  ;;  %v552_v15 = vadd.f32 %v551_v13, %v392_v6 }
 0x268   : > { %573 = vst [vmem:[%s1249_s29 + $0x18] sm:$0xff] %v469_v10  ;;  %575 = vst [vmem:[%s1249_s29 + $0x28] sm:$0xff] %v557_v11 }
 0x269   : > { %574 = vst [vmem:[%s1249_s29 + $0x20] sm:$0xff] %v471_v14  ;;  %572 = vst [vmem:[%s1249_s29 + $0x10] sm:$0xff] %v552_v15  ;;  %v474_v16 = vpop.f32.mrb[4].mxu0  ;;  %v755_v17 = vpop.f32.mrb[2].mxu1 }
 0x26a   : > { %v475_v18 = vadd.f32 %v474_v16, %v384_v0  ;;  %v567_v19 = vadd.f32 %v755_v17, %v392_v6  ;;  %v476_v20 = vpop.f32.mrb[5].mxu0  ;;  %v561_v21 = vpop.f32.mrb[3].mxu1 }
 0x26b   : > { %v477_v22 = vadd.f32 %v476_v20, %v388_v2  ;;  %v562_v23 = vadd.f32 %v561_v21, %v392_v6 }
 0x26c   : > { %576 = vst [vmem:[%s1249_s29 + $0x30] sm:$0xff] %v475_v18  ;;  %581 = vst [vmem:[%s1249_s29 + $0x58] sm:$0xff] %v567_v19 }
 0x26d   : > { %577 = vst [vmem:[%s1249_s29 + $0x38] sm:$0xff] %v477_v22  ;;  %578 = vst [vmem:[%s1249_s29 + $0x40] sm:$0xff] %v562_v23  ;;  %v480_v24 = vpop.f32.mrb[6].mxu0 }
 0x26e   : > { %v481_v25 = vadd.f32 %v480_v24, %v384_v0  ;;  %v482_v26 = vpop.f32.mrb[7].mxu0 }
 0x26f   : > { %v483_v27 = vadd.f32 %v482_v26, %v388_v2 }
 0x270   : > { %579 = vst [vmem:[%s1249_s29 + $0x48] sm:$0xff] %v481_v25 }
 0x271   : > { %580 = vst [vmem:[%s1249_s29 + $0x50] sm:$0xff] %v483_v27 }
 0x272   : > { %965 = shalt.err (!%p962_p7)
}
 0x273   : > { %s966_s14 = scalar_lea.hbm %s1266_s27, 1536  ;;  %s970_s15 = scalar_lea.hbm %s1319_s5, 3072 }
 0x274   : > { %p967_p9 = scmp.ne.s32.totalorder %s1266_s27, %s966_s14  ;;  %p971_p5 = scmp.lt.u32.totalorder %s1266_s27, %s1319_s5 }
 0x275   : > { %p972_p1 = scmp.lt.u32.totalorder %s970_s15, %s966_s14  ;;  %p974_p4 = scmp.lt.u32.totalorder %s966_s14, %s1266_s27 }
 0x276   : > { %p968_p2 = pnand %p967_p9, %p1155_p12 }
 0x277   : > { %p973_p11 = por %p972_p1, %p971_p5 }
 0x278   : > { %p969_p0 = pneg %p968_p2 }
 0x279   : > { %p975_p6 = por %p974_p4, %p973_p11 }
 0x27b   : > { %p976_p8 = pnand %p975_p6, %p969_p0 }
 0x27d   : > { %979 = shalt.err (!%p976_p8)
}
 0x27e   : > { %s1032_s13 = smov 384   ;;  %s1033_s16 = smov 24  }
 0x27f   : > { %828 = dma.vmem_to_hbm [thread:$0]  (%p1155_p12), %s1268_s28, 1536, %s1266_s27, %s583_s22, %s1032_s13, %s1032_s13, %s1033_s16  }
 0x280 PF: > { %s612_s17 = sand.u32 1, %s1010_s18   ;;  %p1334_p10 = scmp.ne.s32.totalorder %s1324_s25, 0 }
 0x281   : > { %p1335_p13 = scmp.ge.s32.totalorder %s1022_s21, 2  ;;  %s613_s11 = scalar_lea.sflag [#allocation4], %s612_s17 }
 0x283   : > { %p839_p3 = pnand %p1335_p13, %p1334_p10 }
 0x285   : > { %1005 = dma.done.wait (!%p839_p3), %s613_s11, 1536  }
 0x286   : > { %1007 = vsyncadd (!%p839_p3), %s613_s11, 4294965760  ;;  %p19_p7 = scmp.ge.s32.totalorder %s1120_s30, 4   ;;  %s1336_s18 = smov %s1014_s19 }
 0x287   : > { %s1337_s19 = smov %s1018_s20  ;;  %s1338_s20 = smov %s1151_s8 }
 0x288   : > { %s1339_s21 = smov %s1120_s30  ;;  %21 = sbr.rel (!%p19_p7) target bundleno = 6 (0x6), region = 89 }
 0x28f   :  { %618 = vsyncpa [#allocation3], 1 }
 0x290   :  { %620 = vsyncpa [#allocation3 + $0x1], 1 }
 0x291   :  { %621 = vsyncpa [#allocation6], 1 }
 0x292   :  { %622 = vsyncpa [#allocation4], 1 }
 0x293   :  { %624 = vsyncpa [#allocation4 + $0x1], 1 }

</bundles_post_ra>
